<compile_context>
chip_gen: v7x
topology: tpu7x:2x2x1
jax: 0.10.0
libtpu: 0.0.40
codegen_flags: <defaults>
</compile_context>

<pallas_src>
import math

import numpy as np
import jax
import jax.numpy as jnp
from jax.experimental import pallas as pl
from jax.experimental.pallas import tpu as pltpu

EPS = 1e-8


def _round_up(x, m):
    return (x + m - 1) // m * m


def make_stft_kernel_matrix(win_len, fft_len, n_cols, dtype=jnp.bfloat16):
    """ConvSTFT weight ('hanning sqrt', 'complex'), transposed for frames @ K
    and zero-padded on the output axis to n_cols (a multiple of 128).
    Columns [0:F] real DFT rows, [F:2F] imag rows, [2F:n_cols] zeros."""
    n = np.arange(win_len)
    hann = 0.5 - 0.5 * np.cos(2.0 * np.pi * n / win_len)    # periodic hann
    window = np.sqrt(hann)                                   # 'hanning sqrt'
    fourier = np.fft.rfft(np.eye(fft_len))[:win_len]         # (win_len, F)
    kmat = np.concatenate([np.real(fourier), np.imag(fourier)], axis=1)
    kmat = kmat * window[:, None]                            # (win_len, 2F)
    out = np.zeros((win_len, n_cols), np.float32)
    out[:, :kmat.shape[1]] = kmat
    return jnp.asarray(out).astype(dtype)


def _build_frames(xp, win_len, hop, n_frames):
    """Gather-free framing (fallback when hop does not divide win_len):
    frames assembled from gcd-sized strided chunk slices of the padded signal."""
    B, Tp = xp.shape
    g = math.gcd(win_len, hop)
    step = hop // g
    nsub = win_len // g
    nch = Tp // g
    ch = xp[:, :nch * g].reshape(B, nch, g)
    parts = []
    for k in range(nsub):
        end = k + (n_frames - 1) * step + 1
        parts.append(ch[:, k:end:step, :])
    return jnp.concatenate(parts, axis=-1)                   # (B, nf, win_len)


def stft_snr_fused(est, clean, kmat, win_len, hop, tile_frames=512):
    """Fused ConvSTFT + stft_snr for one hop.

    Returns -mean_b 10*log10(||s_target||^2 / (||e_noise||^2 + eps) + eps)
    with the spectra computed entirely in VMEM (never written to HBM)."""
    if hop > win_len:
        raise ValueError(f"hop ({hop}) must be <= win_len ({win_len})")
    B, T = est.shape
    n_cols = kmat.shape[1]
    pad = win_len - hop
    Tp = T + 2 * pad
    nf = (Tp - win_len) // hop + 1                    # ConvSTFT frame count

    if win_len % hop == 0:
        g, r, resident = hop, win_len // hop, True    # in-kernel framing path
    else:
        g, r, resident = win_len, 1, False            # fallback: frames in HBM

    tm = min(_round_up(tile_frames, 8), _round_up(nf, 8))
    n_tiles = (nf + tm - 1) // tm
    mask_tail = resident and (n_tiles * tm != nf)     # padded frames may be nonzero

    xp_e = jnp.pad(est, ((0, 0), (pad, pad)))
    xp_c = jnp.pad(clean, ((0, 0), (pad, pad)))

    if resident:
        # Raw signal as hop-sized chunks; frame i = chunks[i : i + r].
        # Full time axis kept resident in VMEM per batch (signal is small).
        # TODO(synk): for extremely long signals, tile the chunk axis with an
        #             (r-1)-row halo instead of keeping it fully resident.
        nc = _round_up(n_tiles * tm + r - 1, 8)
        need = nc * g

        def to_chunks(xp):
            if Tp >= need:
                xp = xp[:, :need]
            else:
                xp = jnp.pad(xp, ((0, 0), (0, need - Tp)))
            return xp.reshape(B, nc, g)

        ch_e, ch_c = to_chunks(xp_e), to_chunks(xp_c)
        chunk_block = (1, nc, g)
        chunk_map = lambda b, t: (b, 0, 0)            # resident along time
    else:
        # TODO(synk): hop % win_len != 0 -> framed signal still materialized in
        #             HBM (gather-free strided build); chunk path avoids this.
        nfp = n_tiles * tm
        fe = _build_frames(xp_e, win_len, hop, nf)
        fc = _build_frames(xp_c, win_len, hop, nf)
        ch_e = jnp.pad(fe, ((0, 0), (0, nfp - nf), (0, 0)))
        ch_c = jnp.pad(fc, ((0, 0), (0, nfp - nf), (0, 0)))
        chunk_block = (1, tm, g)
        chunk_map = lambda b, t: (b, t, 0)

    kmat_r = kmat.reshape(r, g, n_cols)               # K_k sub-matrices (resident)

    def kernel(est_ref, clean_ref, kmat_ref, out_ref, s11_ref, s12_ref, s22_ref):
        t = pl.program_id(1)

        @pl.when(t == 0)
        def _():
            s11_ref[...] = jnp.zeros_like(s11_ref)
            s12_ref[...] = jnp.zeros_like(s12_ref)
            s22_ref[...] = jnp.zeros_like(s22_ref)

        base = t * tm if resident else 0
        a1 = jnp.zeros((tm, n_cols), jnp.float32)     # est spectrum tile
        a2 = jnp.zeros((tm, n_cols), jnp.float32)     # clean spectrum tile
        for k in range(r):                            # r small & static (unrolled)
            kk = kmat_ref[k]                          # (g, n_cols) bf16
            c1 = est_ref[0, pl.ds(base + k, tm), :].astype(kk.dtype)
            c2 = clean_ref[0, pl.ds(base + k, tm), :].astype(kk.dtype)
            a1 = a1 + jnp.dot(c1, kk, preferred_element_type=jnp.float32)
            a2 = a2 + jnp.dot(c2, kk, preferred_element_type=jnp.float32)

        if mask_tail:                                 # zero out frames past nf
            rows = jax.lax.broadcasted_iota(jnp.int32, (tm, 1), 0) + t * tm
            valid = (rows < nf).astype(jnp.float32)
            a1 = a1 * valid
            a2 = a2 * valid

        s11_ref[...] += jnp.sum(a1 * a1, keepdims=True)
        s12_ref[...] += jnp.sum(a1 * a2, keepdims=True)
        s22_ref[...] += jnp.sum(a2 * a2, keepdims=True)

        @pl.when(t == pl.num_programs(1) - 1)
        def _():
            s11 = s11_ref[...]
            s12 = s12_ref[...]
            s22 = s22_ref[...]
            alpha = s12 / (s22 + EPS)                 # s_target = alpha * s2
            t_norm = alpha * alpha * s22              # ||s_target||^2
            n_norm = s11 - 2.0 * alpha * s12 + alpha * alpha * s22
            n_norm = jnp.maximum(n_norm, 0.0)         # guard fp cancellation
            snr = 10.0 * jnp.log10(t_norm / (n_norm + EPS) + EPS)     # (1, 1)
            out_ref[...] = jnp.broadcast_to(snr.reshape(1, 1, 1), (1, 8, 128))

    out = pl.pallas_call(
        kernel,
        grid=(B, n_tiles),
        in_specs=[
            pl.BlockSpec(chunk_block, chunk_map),
            pl.BlockSpec(chunk_block, chunk_map),
            pl.BlockSpec((r, g, n_cols), lambda b, t: (0, 0, 0)),   # resident DFT
        ],
        out_specs=pl.BlockSpec((1, 8, 128), lambda b, t: (b, 0, 0)),
        out_shape=jax.ShapeDtypeStruct((B, 8, 128), jnp.float32),
        scratch_shapes=[pltpu.VMEM((1, 1), jnp.float32) for _ in range(3)],
        compiler_params=pltpu.CompilerParams(
            dimension_semantics=("parallel", "arbitrary"),
            vmem_limit_bytes=32 * 1024 * 1024),
    )(ch_e, ch_c, kmat_r)

    return -jnp.mean(out[:, 0, 0])


class APCSNRMultiFilter:
    """Forward-pass equivalent of the PyTorch APC_SNR_multi_filter loss."""

    def __init__(self, model_hop, model_winlen, theta, mag_bins, hops=(),
                 tile_frames=512):
        self.multi_hop = [h for h in hops if h != model_hop]
        self.eps = EPS
        self.win_len = model_winlen
        self.model_hop = model_hop
        self.fft_len = mag_bins * 2
        self.theta = theta
        self.tile_frames = tile_frames
        two_f = 2 * (self.fft_len // 2 + 1)
        self.n_cols = _round_up(two_f, 128)           # lane-dense MXU N
        self.kmat = make_stft_kernel_matrix(model_winlen, self.fft_len,
                                            self.n_cols, dtype=jnp.bfloat16)
        # TODO(synk): AcousticScaler(theta, mag_bins+1) source unavailable; spectral scales fixed to 1.0.
        # TODO(synk): SingleSrcPMSQE has no Pallas equivalent; pmsqe term is a 0.0 placeholder and the
        #             dead power-spectrum compute that only fed it is skipped (per perf review).
        # TODO(synk): all hops could share one pallas_call (pad frame counts to the max); kept per-hop
        #             fused calls since each call now only streams the raw signal.

    def pmsqe_score(self, est_spec, clean_spec):
        return jnp.zeros((), jnp.float32)

    def __call__(self, est_time_domain, clean):
        hops = [self.model_hop] + list(self.multi_hop)
        snr_total = jnp.zeros((), jnp.float32)
        pmsqe_total = jnp.zeros((), jnp.float32)
        for hop in hops:
            snr_total = snr_total + stft_snr_fused(
                est_time_domain, clean, self.kmat, self.win_len, hop,
                tile_frames=self.tile_frames)
            pmsqe_total = pmsqe_total + self.pmsqe_score(None, None)
        n = float(len(hops))
        return snr_total / n, pmsqe_total / n


def _reference_loss(est, clean, kmat, win_len, hops):
    """Unfused pure-JAX reference (same bf16 matmul inputs, f32 accumulation)."""
    def one_hop(hop):
        B, T = est.shape
        pad = win_len - hop
        xp_e = jnp.pad(est, ((0, 0), (pad, pad)))
        xp_c = jnp.pad(clean, ((0, 0), (pad, pad)))
        Tp = T + 2 * pad
        nf = (Tp - win_len) // hop + 1
        idx = jnp.arange(nf)[:, None] * hop + jnp.arange(win_len)[None, :]
        fe = xp_e[:, idx].astype(jnp.bfloat16)
        fc = xp_c[:, idx].astype(jnp.bfloat16)
        s1 = jnp.matmul(fe, kmat, preferred_element_type=jnp.float32).reshape(B, -1)
        s2 = jnp.matmul(fc, kmat, preferred_element_type=jnp.float32).reshape(B, -1)
        s12 = jnp.sum(s1 * s2, -1, keepdims=True)
        s22 = jnp.sum(s2 * s2, -1, keepdims=True)
        s_t = s12 / (s22 + EPS) * s2
        e_n = s1 - s_t
        t_norm = jnp.sum(s_t * s_t, -1, keepdims=True)
        n_norm = jnp.sum(e_n * e_n, -1, keepdims=True)
        snr = 10.0 * jnp.log10(t_norm / (n_norm + EPS) + EPS)
        return -jnp.mean(snr)

    total = jnp.zeros((), jnp.float32)
    for h in hops:
        total = total + one_hop(h)
    return total / float(len(hops))


if __name__ == "__main__":
    key = jax.random.PRNGKey(0)
    k1, k2 = jax.random.split(key)

    B, T = 2, 128
    model_winlen, model_hop, mag_bins = 32, 16, 16
    hops = (8,)

    est_time = jax.random.normal(k1, (B, T), dtype=jnp.float32)
    clean = jax.random.normal(k2, (B, T), dtype=jnp.float32)

    module = APCSNRMultiFilter(model_hop=model_hop,
                               model_winlen=model_winlen,
                               theta=0.01,
                               mag_bins=mag_bins,
                               hops=hops)

    forward = jax.jit(module.__call__)
    snr_loss, pmsqe_loss = forward(est_time, clean)
    jax.block_until_ready((snr_loss, pmsqe_loss))

    # Correctness sanity check against an unfused pure-JAX reference (same bf16
    # inputs, so only f32 accumulation order differs).
    ref = _reference_loss(est_time, clean, module.kmat, model_winlen,
                          [model_hop] + list(module.multi_hop))
    ref = jax.block_until_ready(ref)
    np.testing.assert_allclose(np.asarray(snr_loss), np.asarray(ref),
                               rtol=2e-3, atol=5e-2)

    print("KERNEL_OK")
</pallas_src>

<mosaic_0001>
module attributes {stable_mosaic.version = 11 : i64} {
  func.func @kernel(%arg0: i32, %arg1: i32, %arg2: memref<1x32x8xf32, #tpu.memory_space<vmem>>, %arg3: memref<1x32x8xf32, #tpu.memory_space<vmem>>, %arg4: memref<4x8x128xbf16, #tpu.memory_space<vmem>>, %arg5: memref<1x8x128xf32, #tpu.memory_space<vmem>>, %arg6: memref<1x1xf32, #tpu.memory_space<vmem>>, %arg7: memref<1x1xf32, #tpu.memory_space<vmem>>, %arg8: memref<1x1xf32, #tpu.memory_space<vmem>>) attributes {dimension_semantics = [#tpu.dimension_semantics<parallel>, #tpu.dimension_semantics<arbitrary>], iteration_bounds = array<i64: 2, 1>, scalar_prefetch = 0 : i64, scratch_operands = 3 : i64, tpu.core_type = #tpu.core_type<tc>, window_params = [{transform_indices = @transform_0, window_bounds = array<i64: 1, 32, 8>}, {transform_indices = @transform_1, window_bounds = array<i64: 1, 32, 8>}, {pipeline_mode = #tpu.pipeline_mode<synchronous>, transform_indices = @transform_2, window_bounds = array<i64: 4, 8, 128>}, {transform_indices = @transform_3, window_bounds = array<i64: 1, 8, 128>}]} {
    %c0_i32 = arith.constant 0 : i32
    %0 = arith.cmpi eq, %arg1, %c0_i32 : i32
    %1 = arith.extui %0 : i1 to i32
    %c0_i32_0 = arith.constant 0 : i32
    %2 = arith.cmpi ne, %1, %c0_i32_0 : i32
    scf.if %2 {
      %cst_57 = arith.constant 0.000000e+00 : f32
      %112 = vector.broadcast %cst_57 : f32 to vector<1x1xf32>
      %c0_58 = arith.constant 0 : index
      %c0_59 = arith.constant 0 : index
      %113 = vector.load %arg6[%c0_58, %c0_59] : memref<1x1xf32, #tpu.memory_space<vmem>>, vector<1x1xf32>
      tpu.vector_store %arg6[%c0_58, %c0_59], %112 {strides = array<i32>} : memref<1x1xf32, #tpu.memory_space<vmem>>, vector<1x1xf32>,
      %cst_60 = arith.constant 0.000000e+00 : f32
      %114 = vector.broadcast %cst_60 : f32 to vector<1x1xf32>
      %c0_61 = arith.constant 0 : index
      %c0_62 = arith.constant 0 : index
      %115 = vector.load %arg7[%c0_61, %c0_62] : memref<1x1xf32, #tpu.memory_space<vmem>>, vector<1x1xf32>
      tpu.vector_store %arg7[%c0_61, %c0_62], %114 {strides = array<i32>} : memref<1x1xf32, #tpu.memory_space<vmem>>, vector<1x1xf32>,
      %cst_63 = arith.constant 0.000000e+00 : f32
      %116 = vector.broadcast %cst_63 : f32 to vector<1x1xf32>
      %c0_64 = arith.constant 0 : index
      %c0_65 = arith.constant 0 : index
      %117 = vector.load %arg8[%c0_64, %c0_65] : memref<1x1xf32, #tpu.memory_space<vmem>>, vector<1x1xf32>
      tpu.vector_store %arg8[%c0_64, %c0_65], %116 {strides = array<i32>} : memref<1x1xf32, #tpu.memory_space<vmem>>, vector<1x1xf32>,
    } else {
    }
    %c24_i32 = arith.constant 24 : i32
    %3 = arith.muli %arg1, %c24_i32 : i32
    %cst = arith.constant 0.000000e+00 : f32
    %4 = vector.broadcast %cst : f32 to vector<24x128xf32>
    %cst_1 = arith.constant 0.000000e+00 : f32
    %5 = vector.broadcast %cst_1 : f32 to vector<24x128xf32>
    %c0 = arith.constant 0 : index
    %c0_2 = arith.constant 0 : index
    %c0_3 = arith.constant 0 : index
    %6 = vector.load %arg4[%c0, %c0_2, %c0_3] : memref<4x8x128xbf16, #tpu.memory_space<vmem>>, vector<1x8x128xbf16>
    %7 = vector.shape_cast %6 : vector<1x8x128xbf16> to vector<8x128xbf16>
    %c0_i32_4 = arith.constant 0 : i32
    %8 = arith.addi %3, %c0_i32_4 : i32
    %c0_5 = arith.constant 0 : index
    %9 = arith.index_cast %8 : i32 to index
    %c0_6 = arith.constant 0 : index
    %10 = vector.load %arg2[%c0_5, %9, %c0_6] : memref<1x32x8xf32, #tpu.memory_space<vmem>>, vector<1x24x8xf32>
    %11 = vector.shape_cast %10 : vector<1x24x8xf32> to vector<24x8xf32>
    %12 = arith.truncf %11 : vector<24x8xf32> to vector<24x8xbf16>
    %c0_i32_7 = arith.constant 0 : i32
    %13 = arith.addi %3, %c0_i32_7 : i32
    %c0_8 = arith.constant 0 : index
    %14 = arith.index_cast %13 : i32 to index
    %c0_9 = arith.constant 0 : index
    %15 = vector.load %arg3[%c0_8, %14, %c0_9] : memref<1x32x8xf32, #tpu.memory_space<vmem>>, vector<1x24x8xf32>
    %16 = vector.shape_cast %15 : vector<1x24x8xf32> to vector<24x8xf32>
    %17 = arith.truncf %16 : vector<24x8xf32> to vector<24x8xbf16>
    %cst_10 = arith.constant dense<0.000000e+00> : vector<24x128xf32>
    %18 = tpu.matmul %12, %7, %cst_10 {dimension_numbers = #tpu.dot_dimension_numbers<[1], [0], [0], [1], [0, 0, 1, 1], [], []>} : vector<24x8xbf16>, vector<8x128xbf16>, vector<24x128xf32> -> vector<24x128xf32>
    %19 = arith.addf %4, %18 : vector<24x128xf32>
    %cst_11 = arith.constant dense<0.000000e+00> : vector<24x128xf32>
    %20 = tpu.matmul %17, %7, %cst_11 {dimension_numbers = #tpu.dot_dimension_numbers<[1], [0], [0], [1], [0, 0, 1, 1], [], []>} : vector<24x8xbf16>, vector<8x128xbf16>, vector<24x128xf32> -> vector<24x128xf32>
    %21 = arith.addf %5, %20 : vector<24x128xf32>
    %c1 = arith.constant 1 : index
    %c0_12 = arith.constant 0 : index
    %c0_13 = arith.constant 0 : index
    %22 = vector.load %arg4[%c1, %c0_12, %c0_13] : memref<4x8x128xbf16, #tpu.memory_space<vmem>>, vector<1x8x128xbf16>
    %23 = vector.shape_cast %22 : vector<1x8x128xbf16> to vector<8x128xbf16>
    %c1_i32 = arith.constant 1 : i32
    %24 = arith.addi %3, %c1_i32 : i32
    %c0_14 = arith.constant 0 : index
    %25 = arith.index_cast %24 : i32 to index
    %c0_15 = arith.constant 0 : index
    %26 = vector.load %arg2[%c0_14, %25, %c0_15] : memref<1x32x8xf32, #tpu.memory_space<vmem>>, vector<1x24x8xf32>
    %27 = vector.shape_cast %26 : vector<1x24x8xf32> to vector<24x8xf32>
    %28 = arith.truncf %27 : vector<24x8xf32> to vector<24x8xbf16>
    %c1_i32_16 = arith.constant 1 : i32
    %29 = arith.addi %3, %c1_i32_16 : i32
    %c0_17 = arith.constant 0 : index
    %30 = arith.index_cast %29 : i32 to index
    %c0_18 = arith.constant 0 : index
    %31 = vector.load %arg3[%c0_17, %30, %c0_18] : memref<1x32x8xf32, #tpu.memory_space<vmem>>, vector<1x24x8xf32>
    %32 = vector.shape_cast %31 : vector<1x24x8xf32> to vector<24x8xf32>
    %33 = arith.truncf %32 : vector<24x8xf32> to vector<24x8xbf16>
    %cst_19 = arith.constant dense<0.000000e+00> : vector<24x128xf32>
    %34 = tpu.matmul %28, %23, %cst_19 {dimension_numbers = #tpu.dot_dimension_numbers<[1], [0], [0], [1], [0, 0, 1, 1], [], []>} : vector<24x8xbf16>, vector<8x128xbf16>, vector<24x128xf32> -> vector<24x128xf32>
    %35 = arith.addf %19, %34 : vector<24x128xf32>
    %cst_20 = arith.constant dense<0.000000e+00> : vector<24x128xf32>
    %36 = tpu.matmul %33, %23, %cst_20 {dimension_numbers = #tpu.dot_dimension_numbers<[1], [0], [0], [1], [0, 0, 1, 1], [], []>} : vector<24x8xbf16>, vector<8x128xbf16>, vector<24x128xf32> -> vector<24x128xf32>
    %37 = arith.addf %21, %36 : vector<24x128xf32>
    %c2 = arith.constant 2 : index
    %c0_21 = arith.constant 0 : index
    %c0_22 = arith.constant 0 : index
    %38 = vector.load %arg4[%c2, %c0_21, %c0_22] : memref<4x8x128xbf16, #tpu.memory_space<vmem>>, vector<1x8x128xbf16>
    %39 = vector.shape_cast %38 : vector<1x8x128xbf16> to vector<8x128xbf16>
    %c2_i32 = arith.constant 2 : i32
    %40 = arith.addi %3, %c2_i32 : i32
    %c0_23 = arith.constant 0 : index
    %41 = arith.index_cast %40 : i32 to index
    %c0_24 = arith.constant 0 : index
    %42 = vector.load %arg2[%c0_23, %41, %c0_24] : memref<1x32x8xf32, #tpu.memory_space<vmem>>, vector<1x24x8xf32>
    %43 = vector.shape_cast %42 : vector<1x24x8xf32> to vector<24x8xf32>
    %44 = arith.truncf %43 : vector<24x8xf32> to vector<24x8xbf16>
    %c2_i32_25 = arith.constant 2 : i32
    %45 = arith.addi %3, %c2_i32_25 : i32
    %c0_26 = arith.constant 0 : index
    %46 = arith.index_cast %45 : i32 to index
    %c0_27 = arith.constant 0 : index
    %47 = vector.load %arg3[%c0_26, %46, %c0_27] : memref<1x32x8xf32, #tpu.memory_space<vmem>>, vector<1x24x8xf32>
    %48 = vector.shape_cast %47 : vector<1x24x8xf32> to vector<24x8xf32>
    %49 = arith.truncf %48 : vector<24x8xf32> to vector<24x8xbf16>
    %cst_28 = arith.constant dense<0.000000e+00> : vector<24x128xf32>
    %50 = tpu.matmul %44, %39, %cst_28 {dimension_numbers = #tpu.dot_dimension_numbers<[1], [0], [0], [1], [0, 0, 1, 1], [], []>} : vector<24x8xbf16>, vector<8x128xbf16>, vector<24x128xf32> -> vector<24x128xf32>
    %51 = arith.addf %35, %50 : vector<24x128xf32>
    %cst_29 = arith.constant dense<0.000000e+00> : vector<24x128xf32>
    %52 = tpu.matmul %49, %39, %cst_29 {dimension_numbers = #tpu.dot_dimension_numbers<[1], [0], [0], [1], [0, 0, 1, 1], [], []>} : vector<24x8xbf16>, vector<8x128xbf16>, vector<24x128xf32> -> vector<24x128xf32>
    %53 = arith.addf %37, %52 : vector<24x128xf32>
    %c3 = arith.constant 3 : index
    %c0_30 = arith.constant 0 : index
    %c0_31 = arith.constant 0 : index
    %54 = vector.load %arg4[%c3, %c0_30, %c0_31] : memref<4x8x128xbf16, #tpu.memory_space<vmem>>, vector<1x8x128xbf16>
    %55 = vector.shape_cast %54 : vector<1x8x128xbf16> to vector<8x128xbf16>
    %c3_i32 = arith.constant 3 : i32
    %56 = arith.addi %3, %c3_i32 : i32
    %c0_32 = arith.constant 0 : index
    %57 = arith.index_cast %56 : i32 to index
    %c0_33 = arith.constant 0 : index
    %58 = vector.load %arg2[%c0_32, %57, %c0_33] : memref<1x32x8xf32, #tpu.memory_space<vmem>>, vector<1x24x8xf32>
    %59 = vector.shape_cast %58 : vector<1x24x8xf32> to vector<24x8xf32>
    %60 = arith.truncf %59 : vector<24x8xf32> to vector<24x8xbf16>
    %c3_i32_34 = arith.constant 3 : i32
    %61 = arith.addi %3, %c3_i32_34 : i32
    %c0_35 = arith.constant 0 : index
    %62 = arith.index_cast %61 : i32 to index
    %c0_36 = arith.constant 0 : index
    %63 = vector.load %arg3[%c0_35, %62, %c0_36] : memref<1x32x8xf32, #tpu.memory_space<vmem>>, vector<1x24x8xf32>
    %64 = vector.shape_cast %63 : vector<1x24x8xf32> to vector<24x8xf32>
    %65 = arith.truncf %64 : vector<24x8xf32> to vector<24x8xbf16>
    %cst_37 = arith.constant dense<0.000000e+00> : vector<24x128xf32>
    %66 = tpu.matmul %60, %55, %cst_37 {dimension_numbers = #tpu.dot_dimension_numbers<[1], [0], [0], [1], [0, 0, 1, 1], [], []>} : vector<24x8xbf16>, vector<8x128xbf16>, vector<24x128xf32> -> vector<24x128xf32>
    %67 = arith.addf %51, %66 : vector<24x128xf32>
    %cst_38 = arith.constant dense<0.000000e+00> : vector<24x128xf32>
    %68 = tpu.matmul %65, %55, %cst_38 {dimension_numbers = #tpu.dot_dimension_numbers<[1], [0], [0], [1], [0, 0, 1, 1], [], []>} : vector<24x8xbf16>, vector<8x128xbf16>, vector<24x128xf32> -> vector<24x128xf32>
    %69 = arith.addf %53, %68 : vector<24x128xf32>
    %70 = tpu.iota {dimensions = array<i32: 0>} : vector<24x1xi32>
    %c24_i32_39 = arith.constant 24 : i32
    %71 = arith.muli %arg1, %c24_i32_39 : i32
    %72 = vector.broadcast %71 : i32 to vector<24x1xi32>
    %73 = arith.addi %70, %72 : vector<24x1xi32>
    %c19_i32 = arith.constant 19 : i32
    %74 = vector.broadcast %c19_i32 : i32 to vector<24x1xi32>
    %75 = arith.cmpi slt, %73, %74 : vector<24x1xi32>
    %76 = arith.extui %75 : vector<24x1xi1> to vector<24x1xi32>
    %77 = arith.sitofp %76 : vector<24x1xi32> to vector<24x1xf32>
    %78 = vector.broadcast %77 : vector<24x1xf32> to vector<24x128xf32>
    %79 = arith.mulf %67, %78 : vector<24x128xf32>
    %80 = vector.broadcast %77 : vector<24x1xf32> to vector<24x128xf32>
    %81 = arith.mulf %69, %80 : vector<24x128xf32>
    %c0_40 = arith.constant 0 : index
    %c0_41 = arith.constant 0 : index
    %82 = vector.load %arg6[%c0_40, %c0_41] : memref<1x1xf32, #tpu.memory_space<vmem>>, vector<1x1xf32>
    %83 = arith.mulf %79, %79 : vector<24x128xf32>
    %84 = vector.shape_cast %83 : vector<24x128xf32> to vector<1x24x128xf32>
    %cst_42 = arith.constant dense<0.000000e+00> : vector<1xf32>
    %85 = vector.multi_reduction <add>, %84, %cst_42 [1, 2] : vector<1x24x128xf32> to vector<1xf32>
    %86 = vector.shape_cast %85 : vector<1xf32> to vector<1x1x1xf32>
    %87 = vector.extract %86[0, 0, 0] : f32 from vector<1x1x1xf32>
    %88 = vector.broadcast %87 : f32 to vector<1x1xf32>
    %89 = arith.addf %82, %88 : vector<1x1xf32>
    %c0_43 = arith.constant 0 : index
    %c0_44 = arith.constant 0 : index
    %90 = vector.load %arg6[%c0_43, %c0_44] : memref<1x1xf32, #tpu.memory_space<vmem>>, vector<1x1xf32>
    tpu.vector_store %arg6[%c0_43, %c0_44], %89 {strides = array<i32>} : memref<1x1xf32, #tpu.memory_space<vmem>>, vector<1x1xf32>,
    %c0_45 = arith.constant 0 : index
    %c0_46 = arith.constant 0 : index
    %91 = vector.load %arg7[%c0_45, %c0_46] : memref<1x1xf32, #tpu.memory_space<vmem>>, vector<1x1xf32>
    %92 = arith.mulf %79, %81 : vector<24x128xf32>
    %93 = vector.shape_cast %92 : vector<24x128xf32> to vector<1x24x128xf32>
    %cst_47 = arith.constant dense<0.000000e+00> : vector<1xf32>
    %94 = vector.multi_reduction <add>, %93, %cst_47 [1, 2] : vector<1x24x128xf32> to vector<1xf32>
    %95 = vector.shape_cast %94 : vector<1xf32> to vector<1x1x1xf32>
    %96 = vector.extract %95[0, 0, 0] : f32 from vector<1x1x1xf32>
    %97 = vector.broadcast %96 : f32 to vector<1x1xf32>
    %98 = arith.addf %91, %97 : vector<1x1xf32>
    %c0_48 = arith.constant 0 : index
    %c0_49 = arith.constant 0 : index
    %99 = vector.load %arg7[%c0_48, %c0_49] : memref<1x1xf32, #tpu.memory_space<vmem>>, vector<1x1xf32>
    tpu.vector_store %arg7[%c0_48, %c0_49], %98 {strides = array<i32>} : memref<1x1xf32, #tpu.memory_space<vmem>>, vector<1x1xf32>,
    %c0_50 = arith.constant 0 : index
    %c0_51 = arith.constant 0 : index
    %100 = vector.load %arg8[%c0_50, %c0_51] : memref<1x1xf32, #tpu.memory_space<vmem>>, vector<1x1xf32>
    %101 = arith.mulf %81, %81 : vector<24x128xf32>
    %102 = vector.shape_cast %101 : vector<24x128xf32> to vector<1x24x128xf32>
    %cst_52 = arith.constant dense<0.000000e+00> : vector<1xf32>
    %103 = vector.multi_reduction <add>, %102, %cst_52 [1, 2] : vector<1x24x128xf32> to vector<1xf32>
    %104 = vector.shape_cast %103 : vector<1xf32> to vector<1x1x1xf32>
    %105 = vector.extract %104[0, 0, 0] : f32 from vector<1x1x1xf32>
    %106 = vector.broadcast %105 : f32 to vector<1x1xf32>
    %107 = arith.addf %100, %106 : vector<1x1xf32>
    %c0_53 = arith.constant 0 : index
    %c0_54 = arith.constant 0 : index
    %108 = vector.load %arg8[%c0_53, %c0_54] : memref<1x1xf32, #tpu.memory_space<vmem>>, vector<1x1xf32>
    tpu.vector_store %arg8[%c0_53, %c0_54], %107 {strides = array<i32>} : memref<1x1xf32, #tpu.memory_space<vmem>>, vector<1x1xf32>,
    %c0_i32_55 = arith.constant 0 : i32
    %109 = arith.cmpi eq, %arg1, %c0_i32_55 : i32
    %110 = arith.extui %109 : i1 to i32
    %c0_i32_56 = arith.constant 0 : i32
    %111 = arith.cmpi ne, %110, %c0_i32_56 : i32
    scf.if %111 {
      %c0_57 = arith.constant 0 : index
      %c0_58 = arith.constant 0 : index
      %112 = vector.load %arg6[%c0_57, %c0_58] : memref<1x1xf32, #tpu.memory_space<vmem>>, vector<1x1xf32>
      %c0_59 = arith.constant 0 : index
      %c0_60 = arith.constant 0 : index
      %113 = vector.load %arg7[%c0_59, %c0_60] : memref<1x1xf32, #tpu.memory_space<vmem>>, vector<1x1xf32>
      %c0_61 = arith.constant 0 : index
      %c0_62 = arith.constant 0 : index
      %114 = vector.load %arg8[%c0_61, %c0_62] : memref<1x1xf32, #tpu.memory_space<vmem>>, vector<1x1xf32>
      %cst_63 = arith.constant 9.99999993E-9 : f32
      %115 = vector.broadcast %cst_63 : f32 to vector<1x1xf32>
      %116 = arith.addf %114, %115 : vector<1x1xf32>
      %117 = arith.divf %113, %116 : vector<1x1xf32>
      %118 = arith.mulf %117, %117 : vector<1x1xf32>
      %119 = arith.mulf %118, %114 : vector<1x1xf32>
      %cst_64 = arith.constant 2.000000e+00 : f32
      %120 = vector.broadcast %cst_64 : f32 to vector<1x1xf32>
      %121 = arith.mulf %120, %117 : vector<1x1xf32>
      %122 = arith.mulf %121, %113 : vector<1x1xf32>
      %123 = arith.subf %112, %122 : vector<1x1xf32>
      %124 = arith.mulf %117, %117 : vector<1x1xf32>
      %125 = arith.mulf %124, %114 : vector<1x1xf32>
      %126 = arith.addf %123, %125 : vector<1x1xf32>
      %cst_65 = arith.constant 0.000000e+00 : f32
      %127 = vector.broadcast %cst_65 : f32 to vector<1x1xf32>
      %128 = arith.maximumf %126, %127 : vector<1x1xf32>
      %cst_66 = arith.constant 9.99999993E-9 : f32
      %129 = vector.broadcast %cst_66 : f32 to vector<1x1xf32>
      %130 = arith.addf %128, %129 : vector<1x1xf32>
      %131 = arith.divf %119, %130 : vector<1x1xf32>
      %cst_67 = arith.constant 9.99999993E-9 : f32
      %132 = vector.broadcast %cst_67 : f32 to vector<1x1xf32>
      %133 = arith.addf %131, %132 : vector<1x1xf32>
      %134 = math.log %133 : vector<1x1xf32>
      %cst_68 = arith.constant 0.434294492 : f32
      %135 = vector.broadcast %cst_68 : f32 to vector<1x1xf32>
      %136 = arith.mulf %134, %135 : vector<1x1xf32>
      %cst_69 = arith.constant 1.000000e+01 : f32
      %137 = vector.broadcast %cst_69 : f32 to vector<1x1xf32>
      %138 = arith.mulf %137, %136 : vector<1x1xf32>
      %139 = vector.shape_cast %138 : vector<1x1xf32> to vector<1x1x1xf32>
      %140 = vector.shape_cast %139 : vector<1x1x1xf32> to vector<1x1x1xf32>
      %141 = vector.broadcast %140 : vector<1x1x1xf32> to vector<1x8x128xf32>
      %c0_70 = arith.constant 0 : index
      %c0_71 = arith.constant 0 : index
      %c0_72 = arith.constant 0 : index
      %142 = vector.load %arg5[%c0_70, %c0_71, %c0_72] : memref<1x8x128xf32, #tpu.memory_space<vmem>>, vector<1x8x128xf32>
      tpu.vector_store %arg5[%c0_70, %c0_71, %c0_72], %141 {strides = array<i32>} : memref<1x8x128xf32, #tpu.memory_space<vmem>>, vector<1x8x128xf32>,
    } else {
    }
    return
  }
  func.func @transform_0(%arg0: i32, %arg1: i32) -> (i32, i32, i32) {
    %c0_i32 = arith.constant 0 : i32
    %c0_i32_0 = arith.constant 0 : i32
    %c0_i32_1 = arith.constant 0 : i32
    return %arg0, %c0_i32, %c0_i32_0 : i32, i32, i32
  }
  func.func @transform_1(%arg0: i32, %arg1: i32) -> (i32, i32, i32) {
    %c0_i32 = arith.constant 0 : i32
    %c0_i32_0 = arith.constant 0 : i32
    %c0_i32_1 = arith.constant 0 : i32
    return %arg0, %c0_i32, %c0_i32_0 : i32, i32, i32
  }
  func.func @transform_2(%arg0: i32, %arg1: i32) -> (i32, i32, i32) {
    %c0_i32 = arith.constant 0 : i32
    %c0_i32_0 = arith.constant 0 : i32
    %c0_i32_1 = arith.constant 0 : i32
    %c0_i32_2 = arith.constant 0 : i32
    return %c0_i32, %c0_i32_0, %c0_i32_1 : i32, i32, i32
  }
  func.func @transform_3(%arg0: i32, %arg1: i32) -> (i32, i32, i32) {
    %c0_i32 = arith.constant 0 : i32
    %c0_i32_0 = arith.constant 0 : i32
    %c0_i32_1 = arith.constant 0 : i32
    return %arg0, %c0_i32, %c0_i32_0 : i32, i32, i32
  }
}

module attributes {stable_mosaic.version = 11 : i64} {
  func.func @kernel(%arg0: i32, %arg1: i32, %arg2: memref<1x24x16xf32, #tpu.memory_space<vmem>>, %arg3: memref<1x24x16xf32, #tpu.memory_space<vmem>>, %arg4: memref<2x16x128xbf16, #tpu.memory_space<vmem>>, %arg5: memref<1x8x128xf32, #tpu.memory_space<vmem>>, %arg6: memref<1x1xf32, #tpu.memory_space<vmem>>, %arg7: memref<1x1xf32, #tpu.memory_space<vmem>>, %arg8: memref<1x1xf32, #tpu.memory_space<vmem>>) attributes {dimension_semantics = [#tpu.dimension_semantics<parallel>, #tpu.dimension_semantics<arbitrary>], iteration_bounds = array<i64: 2, 1>, scalar_prefetch = 0 : i64, scratch_operands = 3 : i64, tpu.core_type = #tpu.core_type<tc>, window_params = [{transform_indices = @transform_0, window_bounds = array<i64: 1, 24, 16>}, {transform_indices = @transform_1, window_bounds = array<i64: 1, 24, 16>}, {pipeline_mode = #tpu.pipeline_mode<synchronous>, transform_indices = @transform_2, window_bounds = array<i64: 2, 16, 128>}, {transform_indices = @transform_3, window_bounds = array<i64: 1, 8, 128>}]} {
    %c0_i32 = arith.constant 0 : i32
    %0 = arith.cmpi eq, %arg1, %c0_i32 : i32
    %1 = arith.extui %0 : i1 to i32
    %c0_i32_0 = arith.constant 0 : i32
    %2 = arith.cmpi ne, %1, %c0_i32_0 : i32
    scf.if %2 {
      %cst_39 = arith.constant 0.000000e+00 : f32
      %80 = vector.broadcast %cst_39 : f32 to vector<1x1xf32>
      %c0_40 = arith.constant 0 : index
      %c0_41 = arith.constant 0 : index
      %81 = vector.load %arg6[%c0_40, %c0_41] : memref<1x1xf32, #tpu.memory_space<vmem>>, vector<1x1xf32>
      tpu.vector_store %arg6[%c0_40, %c0_41], %80 {strides = array<i32>} : memref<1x1xf32, #tpu.memory_space<vmem>>, vector<1x1xf32>,
      %cst_42 = arith.constant 0.000000e+00 : f32
      %82 = vector.broadcast %cst_42 : f32 to vector<1x1xf32>
      %c0_43 = arith.constant 0 : index
      %c0_44 = arith.constant 0 : index
      %83 = vector.load %arg7[%c0_43, %c0_44] : memref<1x1xf32, #tpu.memory_space<vmem>>, vector<1x1xf32>
      tpu.vector_store %arg7[%c0_43, %c0_44], %82 {strides = array<i32>} : memref<1x1xf32, #tpu.memory_space<vmem>>, vector<1x1xf32>,
      %cst_45 = arith.constant 0.000000e+00 : f32
      %84 = vector.broadcast %cst_45 : f32 to vector<1x1xf32>
      %c0_46 = arith.constant 0 : index
      %c0_47 = arith.constant 0 : index
      %85 = vector.load %arg8[%c0_46, %c0_47] : memref<1x1xf32, #tpu.memory_space<vmem>>, vector<1x1xf32>
      tpu.vector_store %arg8[%c0_46, %c0_47], %84 {strides = array<i32>} : memref<1x1xf32, #tpu.memory_space<vmem>>, vector<1x1xf32>,
    } else {
    }
    %c16_i32 = arith.constant 16 : i32
    %3 = arith.muli %arg1, %c16_i32 : i32
    %cst = arith.constant 0.000000e+00 : f32
    %4 = vector.broadcast %cst : f32 to vector<16x128xf32>
    %cst_1 = arith.constant 0.000000e+00 : f32
    %5 = vector.broadcast %cst_1 : f32 to vector<16x128xf32>
    %c0 = arith.constant 0 : index
    %c0_2 = arith.constant 0 : index
    %c0_3 = arith.constant 0 : index
    %6 = vector.load %arg4[%c0, %c0_2, %c0_3] : memref<2x16x128xbf16, #tpu.memory_space<vmem>>, vector<1x16x128xbf16>
    %7 = vector.shape_cast %6 : vector<1x16x128xbf16> to vector<16x128xbf16>
    %c0_i32_4 = arith.constant 0 : i32
    %8 = arith.addi %3, %c0_i32_4 : i32
    %c0_5 = arith.constant 0 : index
    %9 = arith.index_cast %8 : i32 to index
    %c0_6 = arith.constant 0 : index
    %10 = vector.load %arg2[%c0_5, %9, %c0_6] : memref<1x24x16xf32, #tpu.memory_space<vmem>>, vector<1x16x16xf32>
    %11 = vector.shape_cast %10 : vector<1x16x16xf32> to vector<16x16xf32>
    %12 = arith.truncf %11 : vector<16x16xf32> to vector<16x16xbf16>
    %c0_i32_7 = arith.constant 0 : i32
    %13 = arith.addi %3, %c0_i32_7 : i32
    %c0_8 = arith.constant 0 : index
    %14 = arith.index_cast %13 : i32 to index
    %c0_9 = arith.constant 0 : index
    %15 = vector.load %arg3[%c0_8, %14, %c0_9] : memref<1x24x16xf32, #tpu.memory_space<vmem>>, vector<1x16x16xf32>
    %16 = vector.shape_cast %15 : vector<1x16x16xf32> to vector<16x16xf32>
    %17 = arith.truncf %16 : vector<16x16xf32> to vector<16x16xbf16>
    %cst_10 = arith.constant dense<0.000000e+00> : vector<16x128xf32>
    %18 = tpu.matmul %12, %7, %cst_10 {dimension_numbers = #tpu.dot_dimension_numbers<[1], [0], [0], [1], [0, 0, 1, 1], [], []>} : vector<16x16xbf16>, vector<16x128xbf16>, vector<16x128xf32> -> vector<16x128xf32>
    %19 = arith.addf %4, %18 : vector<16x128xf32>
    %cst_11 = arith.constant dense<0.000000e+00> : vector<16x128xf32>
    %20 = tpu.matmul %17, %7, %cst_11 {dimension_numbers = #tpu.dot_dimension_numbers<[1], [0], [0], [1], [0, 0, 1, 1], [], []>} : vector<16x16xbf16>, vector<16x128xbf16>, vector<16x128xf32> -> vector<16x128xf32>
    %21 = arith.addf %5, %20 : vector<16x128xf32>
    %c1 = arith.constant 1 : index
    %c0_12 = arith.constant 0 : index
    %c0_13 = arith.constant 0 : index
    %22 = vector.load %arg4[%c1, %c0_12, %c0_13] : memref<2x16x128xbf16, #tpu.memory_space<vmem>>, vector<1x16x128xbf16>
    %23 = vector.shape_cast %22 : vector<1x16x128xbf16> to vector<16x128xbf16>
    %c1_i32 = arith.constant 1 : i32
    %24 = arith.addi %3, %c1_i32 : i32
    %c0_14 = arith.constant 0 : index
    %25 = arith.index_cast %24 : i32 to index
    %c0_15 = arith.constant 0 : index
    %26 = vector.load %arg2[%c0_14, %25, %c0_15] : memref<1x24x16xf32, #tpu.memory_space<vmem>>, vector<1x16x16xf32>
    %27 = vector.shape_cast %26 : vector<1x16x16xf32> to vector<16x16xf32>
    %28 = arith.truncf %27 : vector<16x16xf32> to vector<16x16xbf16>
    %c1_i32_16 = arith.constant 1 : i32
    %29 = arith.addi %3, %c1_i32_16 : i32
    %c0_17 = arith.constant 0 : index
    %30 = arith.index_cast %29 : i32 to index
    %c0_18 = arith.constant 0 : index
    %31 = vector.load %arg3[%c0_17, %30, %c0_18] : memref<1x24x16xf32, #tpu.memory_space<vmem>>, vector<1x16x16xf32>
    %32 = vector.shape_cast %31 : vector<1x16x16xf32> to vector<16x16xf32>
    %33 = arith.truncf %32 : vector<16x16xf32> to vector<16x16xbf16>
    %cst_19 = arith.constant dense<0.000000e+00> : vector<16x128xf32>
    %34 = tpu.matmul %28, %23, %cst_19 {dimension_numbers = #tpu.dot_dimension_numbers<[1], [0], [0], [1], [0, 0, 1, 1], [], []>} : vector<16x16xbf16>, vector<16x128xbf16>, vector<16x128xf32> -> vector<16x128xf32>
    %35 = arith.addf %19, %34 : vector<16x128xf32>
    %cst_20 = arith.constant dense<0.000000e+00> : vector<16x128xf32>
    %36 = tpu.matmul %33, %23, %cst_20 {dimension_numbers = #tpu.dot_dimension_numbers<[1], [0], [0], [1], [0, 0, 1, 1], [], []>} : vector<16x16xbf16>, vector<16x128xbf16>, vector<16x128xf32> -> vector<16x128xf32>
    %37 = arith.addf %21, %36 : vector<16x128xf32>
    %38 = tpu.iota {dimensions = array<i32: 0>} : vector<16x1xi32>
    %c16_i32_21 = arith.constant 16 : i32
    %39 = arith.muli %arg1, %c16_i32_21 : i32
    %40 = vector.broadcast %39 : i32 to vector<16x1xi32>
    %41 = arith.addi %38, %40 : vector<16x1xi32>
    %c9_i32 = arith.constant 9 : i32
    %42 = vector.broadcast %c9_i32 : i32 to vector<16x1xi32>
    %43 = arith.cmpi slt, %41, %42 : vector<16x1xi32>
    %44 = arith.extui %43 : vector<16x1xi1> to vector<16x1xi32>
    %45 = arith.sitofp %44 : vector<16x1xi32> to vector<16x1xf32>
    %46 = vector.broadcast %45 : vector<16x1xf32> to vector<16x128xf32>
    %47 = arith.mulf %35, %46 : vector<16x128xf32>
    %48 = vector.broadcast %45 : vector<16x1xf32> to vector<16x128xf32>
    %49 = arith.mulf %37, %48 : vector<16x128xf32>
    %c0_22 = arith.constant 0 : index
    %c0_23 = arith.constant 0 : index
    %50 = vector.load %arg6[%c0_22, %c0_23] : memref<1x1xf32, #tpu.memory_space<vmem>>, vector<1x1xf32>
    %51 = arith.mulf %47, %47 : vector<16x128xf32>
    %52 = vector.shape_cast %51 : vector<16x128xf32> to vector<1x16x128xf32>
    %cst_24 = arith.constant dense<0.000000e+00> : vector<1xf32>
    %53 = vector.multi_reduction <add>, %52, %cst_24 [1, 2] : vector<1x16x128xf32> to vector<1xf32>
    %54 = vector.shape_cast %53 : vector<1xf32> to vector<1x1x1xf32>
    %55 = vector.extract %54[0, 0, 0] : f32 from vector<1x1x1xf32>
    %56 = vector.broadcast %55 : f32 to vector<1x1xf32>
    %57 = arith.addf %50, %56 : vector<1x1xf32>
    %c0_25 = arith.constant 0 : index
    %c0_26 = arith.constant 0 : index
    %58 = vector.load %arg6[%c0_25, %c0_26] : memref<1x1xf32, #tpu.memory_space<vmem>>, vector<1x1xf32>
    tpu.vector_store %arg6[%c0_25, %c0_26], %57 {strides = array<i32>} : memref<1x1xf32, #tpu.memory_space<vmem>>, vector<1x1xf32>,
    %c0_27 = arith.constant 0 : index
    %c0_28 = arith.constant 0 : index
    %59 = vector.load %arg7[%c0_27, %c0_28] : memref<1x1xf32, #tpu.memory_space<vmem>>, vector<1x1xf32>
    %60 = arith.mulf %47, %49 : vector<16x128xf32>
    %61 = vector.shape_cast %60 : vector<16x128xf32> to vector<1x16x128xf32>
    %cst_29 = arith.constant dense<0.000000e+00> : vector<1xf32>
    %62 = vector.multi_reduction <add>, %61, %cst_29 [1, 2] : vector<1x16x128xf32> to vector<1xf32>
    %63 = vector.shape_cast %62 : vector<1xf32> to vector<1x1x1xf32>
    %64 = vector.extract %63[0, 0, 0] : f32 from vector<1x1x1xf32>
    %65 = vector.broadcast %64 : f32 to vector<1x1xf32>
    %66 = arith.addf %59, %65 : vector<1x1xf32>
    %c0_30 = arith.constant 0 : index
    %c0_31 = arith.constant 0 : index
    %67 = vector.load %arg7[%c0_30, %c0_31] : memref<1x1xf32, #tpu.memory_space<vmem>>, vector<1x1xf32>
    tpu.vector_store %arg7[%c0_30, %c0_31], %66 {strides = array<i32>} : memref<1x1xf32, #tpu.memory_space<vmem>>, vector<1x1xf32>,
    %c0_32 = arith.constant 0 : index
    %c0_33 = arith.constant 0 : index
    %68 = vector.load %arg8[%c0_32, %c0_33] : memref<1x1xf32, #tpu.memory_space<vmem>>, vector<1x1xf32>
    %69 = arith.mulf %49, %49 : vector<16x128xf32>
    %70 = vector.shape_cast %69 : vector<16x128xf32> to vector<1x16x128xf32>
    %cst_34 = arith.constant dense<0.000000e+00> : vector<1xf32>
    %71 = vector.multi_reduction <add>, %70, %cst_34 [1, 2] : vector<1x16x128xf32> to vector<1xf32>
    %72 = vector.shape_cast %71 : vector<1xf32> to vector<1x1x1xf32>
    %73 = vector.extract %72[0, 0, 0] : f32 from vector<1x1x1xf32>
    %74 = vector.broadcast %73 : f32 to vector<1x1xf32>
    %75 = arith.addf %68, %74 : vector<1x1xf32>
    %c0_35 = arith.constant 0 : index
    %c0_36 = arith.constant 0 : index
    %76 = vector.load %arg8[%c0_35, %c0_36] : memref<1x1xf32, #tpu.memory_space<vmem>>, vector<1x1xf32>
    tpu.vector_store %arg8[%c0_35, %c0_36], %75 {strides = array<i32>} : memref<1x1xf32, #tpu.memory_space<vmem>>, vector<1x1xf32>,
    %c0_i32_37 = arith.constant 0 : i32
    %77 = arith.cmpi eq, %arg1, %c0_i32_37 : i32
    %78 = arith.extui %77 : i1 to i32
    %c0_i32_38 = arith.constant 0 : i32
    %79 = arith.cmpi ne, %78, %c0_i32_38 : i32
    scf.if %79 {
      %c0_39 = arith.constant 0 : index
      %c0_40 = arith.constant 0 : index
      %80 = vector.load %arg6[%c0_39, %c0_40] : memref<1x1xf32, #tpu.memory_space<vmem>>, vector<1x1xf32>
      %c0_41 = arith.constant 0 : index
      %c0_42 = arith.constant 0 : index
      %81 = vector.load %arg7[%c0_41, %c0_42] : memref<1x1xf32, #tpu.memory_space<vmem>>, vector<1x1xf32>
      %c0_43 = arith.constant 0 : index
      %c0_44 = arith.constant 0 : index
      %82 = vector.load %arg8[%c0_43, %c0_44] : memref<1x1xf32, #tpu.memory_space<vmem>>, vector<1x1xf32>
      %cst_45 = arith.constant 9.99999993E-9 : f32
      %83 = vector.broadcast %cst_45 : f32 to vector<1x1xf32>
      %84 = arith.addf %82, %83 : vector<1x1xf32>
      %85 = arith.divf %81, %84 : vector<1x1xf32>
      %86 = arith.mulf %85, %85 : vector<1x1xf32>
      %87 = arith.mulf %86, %82 : vector<1x1xf32>
      %cst_46 = arith.constant 2.000000e+00 : f32
      %88 = vector.broadcast %cst_46 : f32 to vector<1x1xf32>
      %89 = arith.mulf %88, %85 : vector<1x1xf32>
      %90 = arith.mulf %89, %81 : vector<1x1xf32>
      %91 = arith.subf %80, %90 : vector<1x1xf32>
      %92 = arith.mulf %85, %85 : vector<1x1xf32>
      %93 = arith.mulf %92, %82 : vector<1x1xf32>
      %94 = arith.addf %91, %93 : vector<1x1xf32>
      %cst_47 = arith.constant 0.000000e+00 : f32
      %95 = vector.broadcast %cst_47 : f32 to vector<1x1xf32>
      %96 = arith.maximumf %94, %95 : vector<1x1xf32>
      %cst_48 = arith.constant 9.99999993E-9 : f32
      %97 = vector.broadcast %cst_48 : f32 to vector<1x1xf32>
      %98 = arith.addf %96, %97 : vector<1x1xf32>
      %99 = arith.divf %87, %98 : vector<1x1xf32>
      %cst_49 = arith.constant 9.99999993E-9 : f32
      %100 = vector.broadcast %cst_49 : f32 to vector<1x1xf32>
      %101 = arith.addf %99, %100 : vector<1x1xf32>
      %102 = math.log %101 : vector<1x1xf32>
      %cst_50 = arith.constant 0.434294492 : f32
      %103 = vector.broadcast %cst_50 : f32 to vector<1x1xf32>
      %104 = arith.mulf %102, %103 : vector<1x1xf32>
      %cst_51 = arith.constant 1.000000e+01 : f32
      %105 = vector.broadcast %cst_51 : f32 to vector<1x1xf32>
      %106 = arith.mulf %105, %104 : vector<1x1xf32>
      %107 = vector.shape_cast %106 : vector<1x1xf32> to vector<1x1x1xf32>
      %108 = vector.shape_cast %107 : vector<1x1x1xf32> to vector<1x1x1xf32>
      %109 = vector.broadcast %108 : vector<1x1x1xf32> to vector<1x8x128xf32>
      %c0_52 = arith.constant 0 : index
      %c0_53 = arith.constant 0 : index
      %c0_54 = arith.constant 0 : index
      %110 = vector.load %arg5[%c0_52, %c0_53, %c0_54] : memref<1x8x128xf32, #tpu.memory_space<vmem>>, vector<1x8x128xf32>
      tpu.vector_store %arg5[%c0_52, %c0_53, %c0_54], %109 {strides = array<i32>} : memref<1x8x128xf32, #tpu.memory_space<vmem>>, vector<1x8x128xf32>,
    } else {
    }
    return
  }
  func.func @transform_0(%arg0: i32, %arg1: i32) -> (i32, i32, i32) {
    %c0_i32 = arith.constant 0 : i32
    %c0_i32_0 = arith.constant 0 : i32
    %c0_i32_1 = arith.constant 0 : i32
    return %arg0, %c0_i32, %c0_i32_0 : i32, i32, i32
  }
  func.func @transform_1(%arg0: i32, %arg1: i32) -> (i32, i32, i32) {
    %c0_i32 = arith.constant 0 : i32
    %c0_i32_0 = arith.constant 0 : i32
    %c0_i32_1 = arith.constant 0 : i32
    return %arg0, %c0_i32, %c0_i32_0 : i32, i32, i32
  }
  func.func @transform_2(%arg0: i32, %arg1: i32) -> (i32, i32, i32) {
    %c0_i32 = arith.constant 0 : i32
    %c0_i32_0 = arith.constant 0 : i32
    %c0_i32_1 = arith.constant 0 : i32
    %c0_i32_2 = arith.constant 0 : i32
    return %c0_i32, %c0_i32_0, %c0_i32_1 : i32, i32, i32
  }
  func.func @transform_3(%arg0: i32, %arg1: i32) -> (i32, i32, i32) {
    %c0_i32 = arith.constant 0 : i32
    %c0_i32_0 = arith.constant 0 : i32
    %c0_i32_1 = arith.constant 0 : i32
    return %arg0, %c0_i32, %c0_i32_0 : i32, i32, i32
  }
}

</mosaic_0001>

<bundles_post_ra>
// kernel: a_call__.3
= control target key start
LH: loop header
LB: loop body
LE: loop exit
PB: predicated region body
PF: predicated region fallthrough
CT: control target
= control target key end

     0   :  { %s1176_s12 = smov 0   ;;  %s1178_s13 = smov 0   ;;  %s1298_s0 = inlined_call_operand.vmem [shape: f32[2,32,8], index: 0, kind: input, shape index: {}]   ;;  %s1299_s1 = inlined_call_operand.vmem [shape: f32[2,32,8], index: 1, kind: input, shape index: {}]   ;;  %s1300_s2 = inlined_call_operand.vmem [shape: bf16[4,8,128], index: 2, kind: input, shape index: {}]   ;;  %s1301_s3 = inlined_call_operand.vmem [shape: f32[2,8,128], index: 3, kind: output, shape index: {}]  }
   0x1   :  { %s1180_s14 = smov 0  }
   0x2 LB: > { %s25_s15 = sadd.s32 1, %s1148_s13  ;;  %p938_p0 = scmp.ge.s32.totalorder %s1152_s14, 1  ;;  %s1152_s14 = sphi %s1180_s14, %s13_s14   ;;  %s1148_s13 = sphi %s1178_s13, %s1303_s13   ;;  %s1144_s12 = sphi %s1176_s12, %s1302_s12  }
   0x3   : > { %p27_p1 = scmp.ge.s32.totalorder %s25_s15, 2  ;;  %p159_p2 = scmp.lt.s32.totalorder %s1152_s14, 3 }
   0x5   : > { %s1305_s15 = smov (%p27_p1, %s25_s15), 0  ;;  %p160_p3 = pnand %p938_p0, %p159_p2 }
   0x6   : > { %v944_v0 = vld [vmem:[%s1300_s2 + $0x4] sm:$0xf] (!%p160_p3)  ;;  %vm246_vm0 = vcmask (!%p160_p3), 1043456   ;;  %p187_p4 = scmp.lt.s32.totalorder (!%p160_p3), %s1144_s12, 1  ;;  %vm206_vm1 = vcmask (!%p160_p3), 0   ;;  %v1154_v3 = vmov (!%p160_p3), 0.0   ;;  %v727_v49 = vlaneseq (!%p160_p3) }
   0x7   : > { %163 = sbr.rel (%p160_p3) target bundleno = 688 (0x2b0), region = 32  ;;  %1082 = vmatprep.subr.msk.bf16.mxu0 (!%p160_p3), %vm246_vm0, %v944_v0  ;;  %v248_v1 = vsel (!%p160_p3), %vm246_vm0, %v944_v0, 0  ;;  %1084 = vmatprep.subr.msk.bf16.mxu1 (!%p160_p3), %vm246_vm0, %v944_v0  ;;  %v211_v2 = vld [vmem:[%s1300_s2] sm:$0xf] (!%p160_p3)  ;;  %207 = vst.msk [vmem:[#allocation2] sm:$0x1] (!%p160_p3), %vm206_vm1, %v1154_v3 }
   0x8   : > { %1011 = vmatpush3.bf16.msra.mxu0 (!%p160_p3), %v248_v1  ;;  %1023 = vmatpush3.bf16.msra.mxu1 (!%p160_p3), %v248_v1  ;;  %208 = vst.msk [vmem:[#allocation3] sm:$0x1] (!%p160_p3), %vm206_vm1, %v1154_v3  ;;  %209 = vst.msk [vmem:[#allocation4] sm:$0x1] (!%p160_p3), %vm206_vm1, %v1154_v3  ;;  %vm239_vm2 = vcmask (!%p160_p3), 64512   ;;  %v305_v13 = vsel (!%p160_p3), %vm246_vm0, %v211_v2, 0 }
   0x9   : > { %1083 = vmatprep.subr.msk.bf16.mxu0 (!%p160_p3), %vm246_vm0, %v211_v2  ;;  %1085 = vmatprep.subr.msk.bf16.mxu1 (!%p160_p3), %vm246_vm0, %v211_v2  ;;  %v959_v21 = vld [vmem:[%s1300_s2 + $0x8] sm:$0xf] (!%p160_p3)  ;;  %v970_v33 = vld [vmem:[%s1300_s2 + $0xc] sm:$0xf] (!%p160_p3)  ;;  %v1277_v50 = vshrl.u32 (!%p160_p3), %v727_v49, 7 }
   0xa   : > { %v485_v30 = vsel (!%p160_p3), %vm246_vm0, %v959_v21, 0  ;;  %v617_v42 = vsel (!%p160_p3), %vm246_vm0, %v970_v33, 0 }
   0xb   : > { %v730_v51 = vadd.s32 (!%p160_p3), 16, %v1277_v50 }
   0xd   : > { %vm737_vm3 = vcmp.lt.s32.totalorder (!%p160_p3), %v730_v51, 19 }
   0xe   : > { %s1307_s12 = smov (!%p187_p4, %s1144_s12), 1  ;;  %v981_v52 = vsel %vm737_vm3, 1.0, %v1154_v3 }
   0xf   : > { %s984_s20 = sshll.u32 %s1307_s12, 5  ;;  %s943_s7 = sshll.u32 %s1307_s12, 3 }
  0x10   : > { %s1217_s23 = scalar_lea.vmem %s1298_s0, %s984_s20  ;;  %s1222_s26 = scalar_lea.vmem %s1299_s1, %s984_s20 }
  0x11   : > { %v945_v4 = vld [vmem:[%s1217_s23 + $0x1] sm:$0xff]  ;;  %v946_v5 = vld [vmem:[%s1217_s23 + $0x9] sm:$0xff]  ;;  %v947_v9 = vld [vmem:[%s1217_s23 + $0x11] sm:$0xff]  ;;  %s200_s10 = scalar_lea.vmem %s1301_s3, %s943_s7 }
  0x12   : > { %v948_v6 = vld [vmem:[%s1222_s26 + $0x1] sm:$0xff]  ;;  %v231_v7 = vpack.c.bf16 %v946_v5, %v945_v4  ;;  %v949_v8 = vld [vmem:[%s1222_s26 + $0x9] sm:$0xff]  ;;  %v950_v10 = vld [vmem:[%s1222_s26 + $0x11] sm:$0xff]  ;;  %v232_v12 = vpack.c.bf16 %v947_v9, %v947_v9 }
  0x13   : > { %v237_v11 = vpack.c.bf16 %v949_v8, %v948_v6  ;;  %v238_v14 = vpack.c.bf16 %v950_v10, %v950_v10  ;;  %v213_v15 = vld [vmem:[%s1217_s23] sm:$0xff]  ;;  %v214_v16 = vld [vmem:[%s1217_s23 + $0x8] sm:$0xff]  ;;  %v215_v22 = vld [vmem:[%s1217_s23 + $0x10] sm:$0xff] }
  0x14   : > { %v219_v17 = vld [vmem:[%s1222_s26] sm:$0xff]  ;;  %1012 = vmatprep.mubr.msk.bf16.mxu0 %vm239_vm2, %v231_v7  ;;  %v216_v18 = vpack.c.bf16 %v214_v16, %v213_v15  ;;  %v220_v19 = vld [vmem:[%s1222_s26 + $0x8] sm:$0xff]  ;;  %v221_v23 = vld [vmem:[%s1222_s26 + $0x10] sm:$0xff]  ;;  %v217_v26 = vpack.c.bf16 %v215_v22, %v215_v22 }
  0x15   : > { %1024 = vmatprep.mubr.msk.bf16.mxu1 %vm239_vm2, %v237_v11  ;;  %1013 = vmatmul.mubr.msk.bf16.vlgmr.msra.gmra.mrb[0].mxu0 %vm239_vm2, %v232_v12  ;;  %v222_v20 = vpack.c.bf16 %v220_v19, %v219_v17  ;;  %v960_v24 = vld [vmem:[%s1217_s23 + $0x2] sm:$0xff]  ;;  %v961_v25 = vld [vmem:[%s1217_s23 + $0xa] sm:$0xff]  ;;  %v223_v29 = vpack.c.bf16 %v221_v23, %v221_v23  ;;  %v962_v34 = vld [vmem:[%s1217_s23 + $0x12] sm:$0xff] }
  0x16   : > { %1017 = vmatpush3.bf16.msra.mxu0 %v305_v13  ;;  %1025 = vmatmul.mubr.msk.bf16.vlgmr.msra.gmra.mrb[0].mxu1 %vm239_vm2, %v238_v14  ;;  %v963_v27 = vld [vmem:[%s1222_s26 + $0x2] sm:$0xff]  ;;  %v964_v28 = vld [vmem:[%s1222_s26 + $0xa] sm:$0xff]  ;;  %v470_v31 = vpack.c.bf16 %v961_v25, %v960_v24  ;;  %v965_v35 = vld [vmem:[%s1222_s26 + $0x12] sm:$0xff]  ;;  %v471_v38 = vpack.c.bf16 %v962_v34, %v962_v34  ;;  %v1155_v14 = vmov 0  }
  0x17   : > { %1029 = vmatpush3.bf16.msra.mxu1 %v305_v13  ;;  %1018 = vmatprep.mubr.msk.bf16.mxu0 %vm239_vm2, %v216_v18  ;;  %v476_v32 = vpack.c.bf16 %v964_v28, %v963_v27  ;;  %v971_v36 = vld [vmem:[%s1217_s23 + $0x3] sm:$0xff]  ;;  %v972_v37 = vld [vmem:[%s1217_s23 + $0xb] sm:$0xff]  ;;  %v477_v41 = vpack.c.bf16 %v965_v35, %v965_v35  ;;  %v973_v45 = vld [vmem:[%s1217_s23 + $0x13] sm:$0xff] }
  0x18   : > { %1030 = vmatprep.mubr.msk.bf16.mxu1 %vm239_vm2, %v222_v20  ;;  %1086 = vmatprep.subr.msk.bf16.mxu0 %vm246_vm0, %v959_v21  ;;  %v974_v39 = vld [vmem:[%s1222_s26 + $0x3] sm:$0xff]  ;;  %v975_v40 = vld [vmem:[%s1222_s26 + $0xb] sm:$0xff]  ;;  %v602_v43 = vpack.c.bf16 %v972_v37, %v971_v36  ;;  %v976_v46 = vld [vmem:[%s1222_s26 + $0x13] sm:$0xff]  ;;  %v603_v47 = vpack.c.bf16 %v973_v45, %v973_v45 }
  0x19   : > { %1087 = vmatprep.subr.msk.bf16.mxu1 %vm246_vm0, %v959_v21  ;;  %v608_v44 = vpack.c.bf16 %v975_v40, %v974_v39  ;;  %v609_v48 = vpack.c.bf16 %v976_v46, %v976_v46  ;;  %1122 = vset.pattern.permute.xlu1 %v1155_v14  ;;  %v750_v36 = vld [vmem:[#allocation2] sm:$0x1]  ;;  %v769_v39 = vld [vmem:[#allocation3] sm:$0x1]  ;;  %v787_v40 = vld [vmem:[#allocation4] sm:$0x1] }
  0x1a   : > { %1123 = vset.pattern.permute.xlu0 %v1155_v14 }
  0x21   : > { %1019 = vmatmul.mubr.msk.bf16.vlgmr.msra.gmra.mrb[0].mxu0 %vm239_vm2, %v217_v26 }
  0x22   : > { %1031 = vmatmul.mubr.msk.bf16.vlgmr.msra.gmra.mrb[0].mxu1 %vm239_vm2, %v223_v29  ;;  %1035 = vmatpush3.bf16.msra.mxu0 %v485_v30 }
  0x23   : > { %1041 = vmatpush3.bf16.msra.mxu1 %v485_v30  ;;  %1036 = vmatprep.mubr.msk.bf16.mxu0 %vm239_vm2, %v470_v31 }
  0x24   : > { %1042 = vmatprep.mubr.msk.bf16.mxu1 %vm239_vm2, %v476_v32  ;;  %1088 = vmatprep.subr.msk.bf16.mxu0 %vm246_vm0, %v970_v33 }
  0x25   : > { %1089 = vmatprep.subr.msk.bf16.mxu1 %vm246_vm0, %v970_v33 }
  0x2d   : > { %1037 = vmatmul.mubr.msk.bf16.vlgmr.msra.gmra.mrb[0].mxu0 %vm239_vm2, %v471_v38 }
  0x2e   : > { %1043 = vmatmul.mubr.msk.bf16.vlgmr.msra.gmra.mrb[0].mxu1 %vm239_vm2, %v477_v41  ;;  %1047 = vmatpush3.bf16.msra.mxu0 %v617_v42 }
  0x2f   : > { %1053 = vmatpush3.bf16.msra.mxu1 %v617_v42  ;;  %1048 = vmatprep.mubr.msk.bf16.mxu0 %vm239_vm2, %v602_v43 }
  0x30   : > { %1054 = vmatprep.mubr.msk.bf16.mxu1 %vm239_vm2, %v608_v44 }
  0x39   : > { %1049 = vmatmul.mubr.msk.bf16.vlgmr.msra.gmra.mrb[0].mxu0 %vm239_vm2, %v603_v47 }
  0x3a   : > { %1055 = vmatmul.mubr.msk.bf16.vlgmr.msra.gmra.mrb[0].mxu1 %vm239_vm2, %v609_v48 }
 0x10c   : > { %v1050_v53 = vpop.f32.mrb[0].mxu0 }
 0x10d   : > { %v746_v54 = vmul.f32 %v1050_v53, %v981_v52  ;;  %v1056_v55 = vpop.f32.mrb[0].mxu1  ;;  %v653_v56 = vpop.f32.mrb[1].mxu0 }
 0x10e   : > { %v749_v57 = vmul.f32 %v1056_v55, %v981_v52  ;;  %v710_v58 = vpop.f32.mrb[1].mxu1  ;;  %v1051_v59 = vpop.f32.mrb[2].mxu0  ;;  %v751_v0 = vmul.f32 %v653_v56, %v653_v56 }
 0x10f   : > { %v770_v60 = vmul.f32 %v710_v58, %v653_v56  ;;  %v1057_v61 = vpop.f32.mrb[2].mxu1  ;;  %v656_v62 = vpop.f32.mrb[3].mxu0  ;;  %v788_v4 = vmul.f32 %v710_v58, %v710_v58  ;;  %v753_v7 = vmul.f32 %v746_v54, %v746_v54 }
 0x110   : > { %v772_v63 = vmul.f32 %v749_v57, %v746_v54  ;;  %v752_v1 = vmul.f32 %v656_v62, %v656_v62  ;;  %v713_v2 = vpop.f32.mrb[3].mxu1  ;;  %v790_v9 = vmul.f32 %v749_v57, %v749_v57 }
 0x111   : > { %v771_v5 = vmul.f32 %v713_v2, %v656_v62  ;;  %v789_v6 = vmul.f32 %v713_v2, %v713_v2  ;;  %v832_v2 = vsub.s32 0, %v1277_v50 }
 0x112   : > { %v754_v8 = vadd.f32 %v752_v1, %v751_v0 }
 0x113   : > { %v773_v3 = vadd.f32 %v771_v5, %v770_v60  ;;  %v791_v10 = vadd.f32 %v789_v6, %v788_v4 }
 0x114   : > { %v755_v11 = vadd.f32 %v754_v8, %v753_v7 }
 0x115   : > { %v792_v12 = vadd.f32 %v791_v10, %v790_v9  ;;  %v774_v13 = vadd.f32 %v773_v3, %v772_v63 }
 0x116   : > { %756 = vadd.xlane.f32.xlu0 %v755_v11 }
 0x117   : > { %793 = vadd.xlane.f32.xlu1 %v792_v12 }
 0x11a   : > { %775 = vadd.xlane.f32.xlu0 %v774_v13 }
 0x1a3   : > { %v757_v15 = vpop.xlane.xlu0 %756 }
 0x1a4   : > { %v794_v16 = vpop.xlane.xlu1 %793  ;;  %v758_v17 = vrot.slane %v757_v15, 4 }
 0x1a5   : > { %v795_v18 = vrot.slane %v794_v16, 4 }
 0x1a6   : > { %v759_v19 = vadd.f32 %v758_v17, %v757_v15 }
 0x1a7   : > { %v796_v20 = vadd.f32 %v795_v18, %v794_v16  ;;  %v776_v21 = vpop.xlane.xlu0 %775 }
 0x1a8   : > { %v760_v22 = vrot.slane %v759_v19, 2  ;;  %v777_v23 = vrot.slane %v776_v21, 4 }
 0x1a9   : > { %v797_v24 = vrot.slane %v796_v20, 2 }
 0x1aa   : > { %v778_v25 = vadd.f32 %v777_v23, %v776_v21  ;;  %v761_v26 = vadd.f32 %v760_v22, %v759_v19 }
 0x1ab   : > { %v798_v27 = vadd.f32 %v797_v24, %v796_v20 }
 0x1ac   : > { %v779_v28 = vrot.slane %v778_v25, 2  ;;  %v762_v29 = vrot.slane %v761_v26, 1 }
 0x1ad   : > { %v799_v32 = vrot.slane %v798_v27, 1 }
 0x1ae   : > { %v780_v30 = vadd.f32 %v779_v28, %v778_v25  ;;  %v763_v31 = vadd.f32 %v762_v29, %v761_v26 }
 0x1af   : > { %v800_v35 = vadd.f32 %v799_v32, %v798_v27 }
 0x1b0   : > { %1090 = vpush %v763_v31  ;;  %v781_v33 = vrot.slane %v780_v30, 1 }
 0x1b2   : > { %v782_v34 = vadd.f32 %v781_v33, %v780_v30 }
 0x1b4   : > { %1092 = vpush %v782_v34 }
 0x1b5   : > { %1094 = vpush %v800_v35 }
 0x1e1   : > { %s1091_s4 = spop %1090 }
 0x1e2   : > { %v765_v37 = vstv %s1091_s4 }
 0x1e3   : > { %v766_v38 = vadd.f32 %v765_v37, %v750_v36 }
 0x1e5   : > { %768 = vst.msk [vmem:[#allocation2] sm:$0x1] %vm206_vm1, %v766_v38  ;;  %s1093_s5 = spop %1092 }
 0x1e6   : > { %v784_v41 = vstv %s1093_s5  ;;  %s1095_s6 = spop %1094 }
 0x1e7   : > { %v785_v42 = vadd.f32 %v784_v41, %v769_v39  ;;  %v802_v43 = vstv %s1095_s6 }
 0x1e8   : > { %v803_v44 = vadd.f32 %v802_v43, %v787_v40 }
 0x1e9   : > { %786 = vst.msk [vmem:[#allocation3] sm:$0x1] %vm206_vm1, %v785_v42 }
 0x1ea   : > { %804 = vst.msk [vmem:[#allocation4] sm:$0x1] %vm206_vm1, %v803_v44 }
 0x1ec   : > { %v808_v54 = vld [vmem:[#allocation2] sm:$0x1] }
 0x1f0   : > { %v809_v48 = vld [vmem:[#allocation3] sm:$0x1] }
 0x1f1   : > { %v810_v45 = vld [vmem:[#allocation4] sm:$0x1] }
 0x1f2   : > { %v811_v46 = vadd.f32 1e-08, %v810_v45 }
 0x1f4   : > { %1124 = vrcp.f32 %v811_v46 }
 0x1fe   : > { %v1125_v47 = vpop.eup %1124 }
 0x1ff   : > { %v813_v49 = vmul.f32 %v1125_v47, %v809_v48 }
 0x201   : > { %v814_v51 = vmul.f32 %v813_v49, %v813_v49  ;;  %v816_v52 = vmul.f32 2.0, %v813_v49 }
 0x203   : > { %v817_v53 = vmul.f32 %v816_v52, %v809_v48  ;;  %v815_v55 = vmul.f32 %v814_v51, %v810_v45 }
 0x205   : > { %v818_v56 = vsub.f32 %v808_v54, %v817_v53 }
 0x207   : > { %v819_v57 = vadd.f32 %v818_v56, %v815_v55 }
 0x209   : > { %v820_v58 = vmax.f32 %v819_v57, 0.0 }
 0x20b   : > { %v821_v59 = vadd.f32 1e-08, %v820_v58 }
 0x20d   : > { %1126 = vrcp.f32 %v821_v59 }
 0x217   : > { %v1127_v60 = vpop.eup %1126 }
 0x218   : > { %v823_v61 = vmul.f32 %v1127_v60, %v815_v55 }
 0x21a   : > { %v824_v62 = vadd.f32 1e-08, %v823_v61 }
 0x21c   : > { %1128 = vlog2.f32 %v824_v62 }
 0x226   : > { %v1129_v63 = vpop.eup %1128 }
 0x227   : > { %v826_v0 = vmul.f32 0.6931472, %v1129_v63 }
 0x229   : > { %v827_v1 = vmul.f32 0.4342945, %v826_v0 }
 0x22b   : > { %v828_v4 = vmul.f32 10.0, %v827_v1 }
 0x22d   : > { %v833_v5 = vrot.slane %v828_v4, %v832_v2 }
 0x22f   : > { %835 = vperm.xlu1 %1122, %v833_v5  }
 0x2ae   : > { %v836_v6 = vpop.permute.xlu1 %835 }
 0x2af   : > { %838 = vst [vmem:[%s200_s10] sm:$0xff] %v836_v6 }
 0x2b0 PF: > { %s13_s14 = sadd.s32 1, %s1152_s14   ;;  %s1302_s12 = smov %s1148_s13 }
 0x2b1   : > { %p10_p5 = scmp.ge.s32.totalorder %s13_s14, 4   ;;  %s1303_s13 = smov %s1305_s15 }
 0x2b3   :  { %12 = sbr.rel (!%p10_p5) target bundleno = 2 (0x2), region = 84 }

// kernel: a_call__.2
= control target key start
LH: loop header
LB: loop body
LE: loop exit
PB: predicated region body
PF: predicated region fallthrough
CT: control target
= control target key end

     0   :  { %s758_s12 = smov 0   ;;  %s760_s13 = smov 0   ;;  %s834_s0 = inlined_call_operand.vmem [shape: f32[2,24,16], index: 0, kind: input, shape index: {}]   ;;  %s835_s1 = inlined_call_operand.vmem [shape: f32[2,24,16], index: 1, kind: input, shape index: {}]   ;;  %s836_s2 = inlined_call_operand.vmem [shape: bf16[2,16,128], index: 2, kind: input, shape index: {}]   ;;  %s837_s3 = inlined_call_operand.vmem [shape: f32[2,8,128], index: 3, kind: output, shape index: {}]  }
   0x1   :  { %s762_s14 = smov 0  }
   0x2 LB: > { %s25_s15 = sadd.s32 1, %s729_s13  ;;  %p608_p0 = scmp.ge.s32.totalorder %s733_s14, 1  ;;  %s733_s14 = sphi %s762_s14, %s13_s14   ;;  %s729_s13 = sphi %s760_s13, %s839_s13   ;;  %s725_s12 = sphi %s758_s12, %s838_s12  }
   0x3   : > { %p27_p1 = scmp.ge.s32.totalorder %s25_s15, 2  ;;  %p159_p2 = scmp.lt.s32.totalorder %s733_s14, 3 }
   0x5   : > { %s841_s15 = smov (%p27_p1, %s25_s15), 0  ;;  %p160_p3 = pnand %p608_p0, %p159_p2 }
   0x6   : > { %v703_v0 = vld [vmem:[%s836_s2 + $0x8] sm:$0xff] (!%p160_p3)   ;;  %v735_v1 = vmov (!%p160_p3), 0.0   ;;  %p187_p4 = scmp.lt.s32.totalorder (!%p160_p3), %s725_s12, 1  ;;  %vm736_vm0 = vmmov (!%p160_p3), 0   ;;  %v704_v2 = vld [vmem:[%s836_s2] sm:$0xff] (!%p160_p3)   ;;  %vm239_vm1 = vcmask (!%p160_p3), 130048   ;;  %v422_v15 = vlaneseq (!%p160_p3) }
   0x7   : > { %163 = sbr.rel (%p160_p3) target bundleno = 663 (0x297), region = 32  ;;  %635 = vmatprep.subr.bf16.mxu0 (!%p160_p3), %v735_v1  ;;  %647 = vmatprep.subr.bf16.mxu1 (!%p160_p3), %v735_v1  ;;  %vm206_vm3 = vcmask (!%p160_p3), 0   ;;  %v737_v38 = vmov (!%p160_p3), 0  }
   0x8   : > { %636 = vmatpush3.bf16.msra.mxu0 (!%p160_p3), %v703_v0  ;;  %648 = vmatpush3.bf16.msra.mxu1 (!%p160_p3), %v703_v0  ;;  %v807_v16 = vshrl.u32 (!%p160_p3), %v422_v15, 7  ;;  %207 = vst.msk [vmem:[#allocation2] sm:$0x1] (!%p160_p3), %vm206_vm3, %v735_v1  ;;  %208 = vst.msk [vmem:[#allocation3] sm:$0x1] (!%p160_p3), %vm206_vm3, %v735_v1 }
   0x9   : > { %637 = vmatprep.mubr.msk.bf16.mxu0 (!%p160_p3), %vm736_vm0, %v735_v1  ;;  %641 = vmatprep.subr.bf16.mxu0 (!%p160_p3), %v735_v1  ;;  %209 = vst.msk [vmem:[#allocation4] sm:$0x1] (!%p160_p3), %vm206_vm3, %v735_v1 }
   0xa   : > { %649 = vmatprep.mubr.msk.bf16.mxu1 (!%p160_p3), %vm736_vm0, %v735_v1  ;;  %653 = vmatprep.subr.bf16.mxu1 (!%p160_p3), %v735_v1  ;;  %v424_v17 = vadd.s32 (!%p160_p3), 8, %v807_v16 }
   0xb   : > { %701 = vset.pattern.permute.xlu1 (!%p160_p3), %v737_v38  ;;  %702 = vset.pattern.permute.xlu0 (!%p160_p3), %v737_v38 }
   0xc   : > { %vm429_vm2 = vcmp.lt.s32.totalorder (!%p160_p3), %v424_v17, 9 }
   0xd   : > { %v624_v19 = vsel (!%p160_p3), %vm429_vm2, 1.0, %v735_v1 }
   0xe   : > { %s843_s12 = smov (!%p187_p4, %s725_s12), 1 }
   0xf   : > { %s667_s18 = smul.u32 24, %s843_s12  ;;  %v438_v60 = vld [vmem:[#allocation2] sm:$0x1]  ;;  %v455_v63 = vld [vmem:[#allocation3] sm:$0x1]  ;;  %s611_s30 = sshll.u32 %s843_s12, 3 }
  0x10   : > { %v471_v0 = vld [vmem:[#allocation4] sm:$0x1]  ;;  %s200_s6 = scalar_lea.vmem %s837_s3, %s611_s30 }
  0x11   : > { %s191_s21 = scalar_lea.vmem %s834_s0, %s667_s18  ;;  %s196_s26 = scalar_lea.vmem %s835_s1, %s667_s18 }
  0x12   : > { %v614_v3 = vld [vmem:[%s191_s21 + $0x1] sm:$0xff]  ;;  %v615_v4 = vld [vmem:[%s191_s21 + $0x9] sm:$0xff] }
  0x13   : > { %v616_v5 = vld [vmem:[%s196_s26 + $0x1] sm:$0xff]  ;;  %v228_v6 = vpack.c.bf16 %v615_v4, %v614_v3  ;;  %v617_v7 = vld [vmem:[%s196_s26 + $0x9] sm:$0xff] }
  0x14   : > { %v232_v8 = vpack.c.bf16 %v617_v7, %v616_v5  ;;  %v214_v9 = vld [vmem:[%s191_s21] sm:$0xff]  ;;  %v215_v10 = vld [vmem:[%s191_s21 + $0x8] sm:$0xff] }
  0x15   : > { %638 = vmatmul.mubr.msk.bf16.vlgmr.msra.gmra.mrb[0].mxu0 %vm239_vm1, %v228_v6  ;;  %v218_v11 = vld [vmem:[%s196_s26] sm:$0xff]  ;;  %v219_v12 = vld [vmem:[%s196_s26 + $0x8] sm:$0xff]  ;;  %v216_v13 = vpack.c.bf16 %v215_v10, %v214_v9 }
  0x16   : > { %642 = vmatpush3.bf16.msra.mxu0 %v704_v2  ;;  %650 = vmatmul.mubr.msk.bf16.vlgmr.msra.gmra.mrb[0].mxu1 %vm239_vm1, %v232_v8  ;;  %v220_v14 = vpack.c.bf16 %v219_v12, %v218_v11 }
  0x17   : > { %654 = vmatpush3.bf16.msra.mxu1 %v704_v2  ;;  %643 = vmatprep.mubr.msk.bf16.mxu0 %vm736_vm0, %v735_v1 }
  0x18   : > { %655 = vmatprep.mubr.msk.bf16.mxu1 %vm736_vm0, %v735_v1 }
  0x21   : > { %644 = vmatmul.mubr.msk.bf16.vlgmr.msra.gmra.mrb[0].mxu0 %vm239_vm1, %v216_v13 }
  0x22   : > { %656 = vmatmul.mubr.msk.bf16.vlgmr.msra.gmra.mrb[0].mxu1 %vm239_vm1, %v220_v14 }
  0xf4   : > { %v327_v18 = vpop.f32.mrb[0].mxu0 }
  0xf5   : > { %v415_v20 = vpop.f32.mrb[0].mxu1  ;;  %v645_v21 = vpop.f32.mrb[1].mxu0  ;;  %v439_v30 = vmul.f32 %v327_v18, %v327_v18 }
  0xf6   : > { %v456_v22 = vmul.f32 %v415_v20, %v327_v18  ;;  %v657_v23 = vpop.f32.mrb[1].mxu1  ;;  %v330_v24 = vpop.f32.mrb[2].mxu0  ;;  %v472_v32 = vmul.f32 %v415_v20, %v415_v20 }
  0xf7   : > { %v435_v25 = vmul.f32 %v624_v19, %v330_v24  ;;  %v418_v26 = vpop.f32.mrb[2].mxu1  ;;  %v646_v27 = vpop.f32.mrb[3].mxu0 }
  0xf8   : > { %v437_v28 = vmul.f32 %v624_v19, %v418_v26  ;;  %v658_v29 = vpop.f32.mrb[3].mxu1  ;;  %v514_v26 = vsub.s32 0, %v807_v16 }
  0xf9   : > { %v440_v31 = vmul.f32 %v435_v25, %v435_v25 }
  0xfa   : > { %v457_v33 = vmul.f32 %v437_v28, %v435_v25  ;;  %v473_v34 = vmul.f32 %v437_v28, %v437_v28 }
  0xfb   : > { %v441_v35 = vadd.f32 %v440_v31, %v439_v30 }
  0xfc   : > { %v474_v36 = vadd.f32 %v473_v34, %v472_v32  ;;  %v458_v37 = vadd.f32 %v457_v33, %v456_v22 }
  0xfd   : > { %442 = vadd.xlane.f32.xlu0 %v441_v35 }
  0xfe   : > { %475 = vadd.xlane.f32.xlu1 %v474_v36 }
 0x101   : > { %459 = vadd.xlane.f32.xlu0 %v458_v37 }
 0x18a   : > { %v443_v39 = vpop.xlane.xlu0 %442 }
 0x18b   : > { %v476_v40 = vpop.xlane.xlu1 %475  ;;  %v444_v41 = vrot.slane %v443_v39, 4 }
 0x18c   : > { %v477_v42 = vrot.slane %v476_v40, 4 }
 0x18d   : > { %v445_v43 = vadd.f32 %v444_v41, %v443_v39 }
 0x18e   : > { %v478_v44 = vadd.f32 %v477_v42, %v476_v40  ;;  %v460_v45 = vpop.xlane.xlu0 %459 }
 0x18f   : > { %v446_v46 = vrot.slane %v445_v43, 2  ;;  %v461_v47 = vrot.slane %v460_v45, 4 }
 0x190   : > { %v479_v48 = vrot.slane %v478_v44, 2 }
 0x191   : > { %v462_v49 = vadd.f32 %v461_v47, %v460_v45  ;;  %v447_v50 = vadd.f32 %v446_v46, %v445_v43 }
 0x192   : > { %v480_v51 = vadd.f32 %v479_v48, %v478_v44 }
 0x193   : > { %v463_v52 = vrot.slane %v462_v49, 2  ;;  %v448_v53 = vrot.slane %v447_v50, 1 }
 0x194   : > { %v481_v56 = vrot.slane %v480_v51, 1 }
 0x195   : > { %v464_v54 = vadd.f32 %v463_v52, %v462_v49  ;;  %v449_v55 = vadd.f32 %v448_v53, %v447_v50 }
 0x196   : > { %v482_v59 = vadd.f32 %v481_v56, %v480_v51 }
 0x197   : > { %668 = vpush %v449_v55  ;;  %v465_v57 = vrot.slane %v464_v54, 1 }
 0x199   : > { %v466_v58 = vadd.f32 %v465_v57, %v464_v54 }
 0x19b   : > { %670 = vpush %v466_v58 }
 0x19c   : > { %672 = vpush %v482_v59 }
 0x1c8   : > { %s669_s27 = spop %668 }
 0x1c9   : > { %v451_v61 = vstv %s669_s27 }
 0x1ca   : > { %v452_v62 = vadd.f32 %v451_v61, %v438_v60 }
 0x1cc   : > { %454 = vst.msk [vmem:[#allocation2] sm:$0x1] %vm206_vm3, %v452_v62  ;;  %s671_s28 = spop %670 }
 0x1cd   : > { %v468_v1 = vstv %s671_s28  ;;  %s673_s29 = spop %672 }
 0x1ce   : > { %v469_v2 = vadd.f32 %v468_v1, %v455_v63  ;;  %v484_v3 = vstv %s673_s29 }
 0x1cf   : > { %v485_v4 = vadd.f32 %v484_v3, %v471_v0 }
 0x1d0   : > { %470 = vst.msk [vmem:[#allocation3] sm:$0x1] %vm206_vm3, %v469_v2 }
 0x1d1   : > { %486 = vst.msk [vmem:[#allocation4] sm:$0x1] %vm206_vm3, %v485_v4 }
 0x1d3   : > { %v490_v13 = vld [vmem:[#allocation2] sm:$0x1] }
 0x1d7   : > { %v491_v8 = vld [vmem:[#allocation3] sm:$0x1] }
 0x1d8   : > { %v492_v5 = vld [vmem:[#allocation4] sm:$0x1] }
 0x1d9   : > { %v493_v6 = vadd.f32 1e-08, %v492_v5 }
 0x1db   : > { %705 = vrcp.f32 %v493_v6 }
 0x1e5   : > { %v706_v7 = vpop.eup %705 }
 0x1e6   : > { %v495_v9 = vmul.f32 %v706_v7, %v491_v8 }
 0x1e8   : > { %v496_v10 = vmul.f32 %v495_v9, %v495_v9  ;;  %v498_v11 = vmul.f32 2.0, %v495_v9 }
 0x1ea   : > { %v499_v12 = vmul.f32 %v498_v11, %v491_v8  ;;  %v497_v14 = vmul.f32 %v496_v10, %v492_v5 }
 0x1ec   : > { %v500_v15 = vsub.f32 %v490_v13, %v499_v12 }
 0x1ee   : > { %v501_v17 = vadd.f32 %v500_v15, %v497_v14 }
 0x1f0   : > { %v502_v18 = vmax.f32 %v501_v17, 0.0 }
 0x1f2   : > { %v503_v19 = vadd.f32 1e-08, %v502_v18 }
 0x1f4   : > { %707 = vrcp.f32 %v503_v19 }
 0x1fe   : > { %v708_v20 = vpop.eup %707 }
 0x1ff   : > { %v505_v21 = vmul.f32 %v708_v20, %v497_v14 }
 0x201   : > { %v506_v22 = vadd.f32 1e-08, %v505_v21 }
 0x203   : > { %709 = vlog2.f32 %v506_v22 }
 0x20d   : > { %v710_v23 = vpop.eup %709 }
 0x20e   : > { %v508_v24 = vmul.f32 0.6931472, %v710_v23 }
 0x210   : > { %v509_v25 = vmul.f32 0.4342945, %v508_v24 }
 0x212   : > { %v510_v27 = vmul.f32 10.0, %v509_v25 }
 0x214   : > { %v515_v28 = vrot.slane %v510_v27, %v514_v26 }
 0x216   : > { %517 = vperm.xlu1 %701, %v515_v28  }
 0x295   : > { %v518_v29 = vpop.permute.xlu1 %517 }
 0x296   : > { %520 = vst [vmem:[%s200_s6] sm:$0xff] %v518_v29 }
 0x297 PF: > { %s13_s14 = sadd.s32 1, %s733_s14   ;;  %s838_s12 = smov %s729_s13 }
 0x298   : > { %p10_p5 = scmp.ge.s32.totalorder %s13_s14, 4   ;;  %s839_s13 = smov %s841_s15 }
 0x29a   :  { %12 = sbr.rel (!%p10_p5) target bundleno = 2 (0x2), region = 78 }

</bundles_post_ra>
